<compile_context>
chip_gen: v5e
topology: v5e:2x2
jax: 0.10.0
libtpu: 0.0.40
codegen_flags: <defaults>
</compile_context>

<pallas_src>
import functools

import jax
import jax.numpy as jnp
from jax.experimental import pallas as pl
from jax.experimental.pallas import tpu as pltpu

_MIB = 1024 * 1024


def _last_pool_kernel(x_ref, o_ref, *, lane):
    # x_ref: (b_tile, c_tile, t_block) VMEM tile; o_ref: (b_tile, c_tile).
    # `lane` is the static index of time step T-1 inside the trailing window.
    # NOTE: padded lanes of a partial trailing T block contain garbage, so we
    # only ever read this single valid lane (never reduce over t_block).
    o_ref[...] = x_ref[:, :, lane]


def _sublane_multiple(dtype) -> int:
    # Native sublane packing: 8 rows for 32-bit, 16 for bf16/fp16, 32 for int8/fp8.
    return max(8, 32 // jnp.dtype(dtype).itemsize)


def _target_block_bytes() -> int:
    """Per-input-block DMA byte budget, biased larger on v7x."""
    target = 2 * _MIB
    try:
        info = pltpu.get_tpu_info()
        vmem = getattr(info, "vmem_capacity_bytes", None)
        # v7x: 64 MiB VMEM/TC but ~3.2 TB/s HBM -> bigger blocks so the fixed
        # per-grid-step overhead stays a small fraction of the (shorter) DMA.
        if vmem is not None and vmem <= 64 * _MIB:
            target = 4 * _MIB
    except Exception:
        # Not on TPU / API unavailable: keep the conservative default that
        # fits every generation's scoped-VMEM default comfortably.
        pass
    return target


def last_pool_rnn(
    x,
    bidirectional: bool = False,
    *,
    b_tile: int | None = None,
    c_tile: int | None = None,
    input_buffer_count: int = 2,
):
    """Pallas implementation of LastPoolRNN.forward.

    x: (B, C, T) array. Returns (B, C) = x[:, :, -1].
    The `bidirectional=True` branch of the original module degenerates to the
    same computation (see header comment), so both flags share one kernel.

    input_buffer_count: pipeline depth for the input BlockSpec (default 2 =
    plain double buffering). Per review, 3 is only worth sweeping when blocks
    are < ~512 KiB, which the byte-budgeted b_tile already avoids.
    """
    del bidirectional  # both branches are numerically identical (see above)
    B, C, T = x.shape
    itemsize = jnp.dtype(x.dtype).itemsize
    sublane = _sublane_multiple(x.dtype)

    # --- T window: only the lane-aligned 128-wide block holding index T-1 ---
    if T >= 128:
        t_block = 128
        t_block_idx = (T - 1) // 128        # block containing index T-1
        lane = (T - 1) % 128                # position of T-1 inside that block
    else:
        t_block = T                         # full extent satisfies tiling rule
        t_block_idx = 0
        lane = T - 1

    # --- C tiling: multiple of 128 (lane-dense output store) or full extent ---
    if c_tile is None:
        c_tile = min(C, 512) if C % 128 == 0 else C
    c_tile = min(c_tile, C)

    # --- B tiling: byte-budgeted, dtype-sublane aligned (or full extent) ---
    if b_tile is None:
        target = _target_block_bytes()
        denom = max(1, c_tile * t_block * itemsize)
        bt = max(sublane, (target // denom) // sublane * sublane)
        b_tile = B if bt >= B else bt
    b_tile = min(b_tile, B)

    nb = pl.cdiv(B, b_tile)
    nc = pl.cdiv(C, c_tile)

    # Guarantee >=2 grid points when possible so ("parallel", "parallel")
    # actually lets v7x's two TensorCores split the bandwidth-bound copy.
    if nb * nc == 1 and B > sublane:
        half = (((B + 1) // 2) + sublane - 1) // sublane * sublane
        if half < B:
            b_tile = half
            nb = pl.cdiv(B, b_tile)

    # --- VMEM budget (explicit: v5e scoped default is only ~16 MiB) ---
    in_block_bytes = b_tile * c_tile * t_block * itemsize
    out_block_bytes = b_tile * c_tile * itemsize
    needed = (max(2, input_buffer_count) * in_block_bytes
              + 2 * out_block_bytes + 2 * _MIB)
    vmem_limit = int(min(max(needed, 16 * _MIB), 40 * _MIB))

    cost = pl.CostEstimate(
        flops=0,
        transcendentals=0,
        # Only the trailing T window is read; B*C elements are written.
        bytes_accessed=B * C * t_block * itemsize + B * C * itemsize,
    )

    in_spec_kwargs = {}
    if input_buffer_count != 2:
        in_spec_kwargs["pipeline_mode"] = pl.Buffered(input_buffer_count)

    kernel = functools.partial(_last_pool_kernel, lane=lane)

    return pl.pallas_call(
        kernel,
        out_shape=jax.ShapeDtypeStruct((B, C), x.dtype),
        grid=(nb, nc),
        in_specs=[
            pl.BlockSpec(
                (b_tile, c_tile, t_block),
                lambda i, j: (i, j, t_block_idx),
                **in_spec_kwargs,
            ),
        ],
        out_specs=pl.BlockSpec((b_tile, c_tile), lambda i, j: (i, j)),
        compiler_params=pltpu.CompilerParams(
            dimension_semantics=("parallel", "parallel"),  # megacore sharding
            vmem_limit_bytes=vmem_limit,
        ),
        cost_estimate=cost,
    )(x)


if __name__ == "__main__":
    key = jax.random.PRNGKey(0)
    keys = jax.random.split(key, 5)

    # 1) Small smoke test in the module's (B, C, T) convention; both flags.
    B, C, T = 2, 8, 16
    x = jax.random.normal(keys[0], (B, C, T), dtype=jnp.float32)
    out_uni = last_pool_rnn(x, bidirectional=False)
    out_bi = last_pool_rnn(x, bidirectional=True)
    jax.block_until_ready((out_uni, out_bi))
    ref = x[:, :, -1]
    assert out_uni.shape == (B, C) and jnp.allclose(out_uni, ref)
    assert out_bi.shape == (B, C) and jnp.allclose(out_bi, ref)

    # 2) Windowed T path (T >= 128, T % 128 != 0 -> partial trailing block).
    x2 = jax.random.normal(keys[1], (3, 16, 160), dtype=jnp.float32)
    out2 = last_pool_rnn(x2)
    jax.block_until_ready(out2)
    assert out2.shape == (3, 16) and jnp.allclose(out2, x2[:, :, -1])

    # 3) Wide hidden -> C grid axis (c_tile multiple of 128) + multi-step B.
    x3 = jax.random.normal(keys[2], (16, 1024, 256), dtype=jnp.float32)
    out3 = last_pool_rnn(x3)
    jax.block_until_ready(out3)
    assert out3.shape == (16, 1024) and jnp.allclose(out3, x3[:, :, -1])

    # 4) bf16 (sublane packing 16) + partial trailing T block + multi-step B.
    x4 = jax.random.normal(keys[3], (64, 384, 300), dtype=jnp.float32).astype(jnp.bfloat16)
    out4 = last_pool_rnn(x4)
    jax.block_until_ready(out4)
    assert out4.shape == (64, 384) and out4.dtype == jnp.bfloat16
    assert jnp.array_equal(out4, x4[:, :, -1])

    # 5) Shape where the naive grid collapses to one point -> split over B so
    #    both v7x TensorCores participate.
    x5 = jax.random.normal(keys[4], (16, 8, 128), dtype=jnp.float32)
    out5 = last_pool_rnn(x5)
    jax.block_until_ready(out5)
    assert out5.shape == (16, 8) and jnp.allclose(out5, x5[:, :, -1])

    print("KERNEL_OK")
</pallas_src>

<mosaic_0001>
module attributes {stable_mosaic.version = 11 : i64} {
  func.func @_last_pool_kernel(%arg0: i32, %arg1: i32, %arg2: memref<2x8x16xf32, #tpu.memory_space<vmem>>, %arg3: memref<2x8xf32, #tpu.memory_space<vmem>>) attributes {dimension_semantics = [#tpu.dimension_semantics<parallel>, #tpu.dimension_semantics<parallel>], iteration_bounds = array<i64: 1, 1>, scalar_prefetch = 0 : i64, scratch_operands = 0 : i64, tpu.core_type = #tpu.core_type<tc>, window_params = [{transform_indices = @transform_0, window_bounds = array<i64: 2, 8, 16>}, {transform_indices = @transform_1, window_bounds = array<i64: 2, 8>}]} {
    %c0 = arith.constant 0 : index
    %c0_0 = arith.constant 0 : index
    %c15 = arith.constant 15 : index
    %0 = vector.load %arg2[%c0, %c0_0, %c15] : memref<2x8x16xf32, #tpu.memory_space<vmem>>, vector<2x8x1xf32>
    %1 = vector.shape_cast %0 : vector<2x8x1xf32> to vector<2x8xf32>
    %c0_1 = arith.constant 0 : index
    %c0_2 = arith.constant 0 : index
    %2 = vector.load %arg3[%c0_1, %c0_2] : memref<2x8xf32, #tpu.memory_space<vmem>>, vector<2x8xf32>
    tpu.vector_store %arg3[%c0_1, %c0_2], %1 {strides = array<i32>} : memref<2x8xf32, #tpu.memory_space<vmem>>, vector<2x8xf32>,
    return
  }
  func.func @transform_0(%arg0: i32, %arg1: i32) -> (i32, i32, i32) {
    %c0_i32 = arith.constant 0 : i32
    %c0_i32_0 = arith.constant 0 : i32
    return %arg0, %arg1, %c0_i32 : i32, i32, i32
  }
  func.func @transform_1(%arg0: i32, %arg1: i32) -> (i32, i32) {
    %c0_i32 = arith.constant 0 : i32
    return %arg0, %arg1 : i32, i32
  }
}

</mosaic_0001>

<bundles_post_ra>
// kernel: tpu_custom_call.1
= control target key start
LH: loop header
LB: loop body
LE: loop exit
PB: predicated region body
PF: predicated region fallthrough
CT: control target
= control target key end

     0   :  { %6 = vsyncpa [#allocation3], 0  ;;  %s140_s0 = inlined_call_operand.hbm [shape: f32[2,8,16], index: 0, kind: input, shape index: {}]   ;;  %s141_s1 = inlined_call_operand.hbm [shape: f32[2,8], index: 1, kind: output, shape index: {}]  }
   0x1   :  { %7 = vsyncpa [#allocation4], 0  ;;  %s12_s8 = sshll.u32 %s140_s0, 4  ;;  %s119_s9 = smov [#allocation2]   ;;  %s13_s8 = int_to_ptr.hbm [resolvable:$true] %s12_s8 }
   0x2   :  { %s14_s10 = sshll.u32 %s119_s9, 4  ;;  %s120_s11 = smov 128   ;;  %s15_s10 = int_to_ptr.vmem [resolvable:$true] %s14_s10 }
   0x3   :  { %s121_s12 = smov 8  }
   0x4   :  { %20 = dma.hbm_to_vmem [thread:$0]  %s13_s8, 256, %s15_s10, [#allocation3], %s120_s11, %s120_s11, %s121_s12  }
   0x5   :  { %115 = dma.done.wait [#allocation3], 256  }
   0x6   :  { %116 = vsyncadd [#allocation3], 4294967040  ;;  %v122_v0 = vmov 15   ;;  %v25_v1 = vld [vmem:[#allocation2] sm:$0xff]  ;;  %v26_v2 = vld [vmem:[#allocation2 + $0x8] sm:$0xff]  ;;  %v35_v4 = vlaneseq  ;;  %s123_s13 = smov [#allocation5]  }
   0x7   :  { %66 = vset.pattern.permute.xlu0 %v122_v0  ;;  %s49_s0 = sshll.u32 %s123_s13, 4  ;;  %s51_s16 = sshll.u32 %s141_s1, 4  ;;  %vm39_vm0 = vcmask 1041409   ;;  %vm42_vm1 = vcmask 58368   ;;  %s50_s0 = int_to_ptr.vmem [resolvable:$true] %s49_s0  ;;  %s52_s16 = int_to_ptr.hbm [resolvable:$true] %s51_s16 }
   0x8   :  { %30 = vperm.xlu0 %66, %v25_v1   ;;  %v36_v5 = vand.u32 127, %v35_v4 }
  0x10   :  { %33 = vperm.xlu0 %66, %v26_v2  }
  0x7a   :  { %v31_v3 = vpop.permute.xlu0 %30 }
  0x7b   :  { %v37_v7 = vperm.slane %v31_v3, %v36_v5 }
  0x82   :  { %v34_v6 = vpop.permute.xlu0 %33 }
  0x83   :  { %v38_v8 = vperm.slane %v34_v6, %v36_v5 }
  0x85   :  { %v40_v9 = vsel %vm39_vm0, %v38_v8, %v37_v7 }
  0x86   :  { %43 = vst.msk [vmem:[#allocation5] sm:$0x3] %vm42_vm1, %v40_v9 }
  0x87   :  { %54 = dma.vmem_to_hbm [thread:$0]  %s50_s0, 32, %s52_s16, [#allocation4]  }
  0x88   :  { %117 = dma.done.wait [#allocation4], 32  }
  0x89   :  { %118 = vsyncadd [#allocation4], 4294967264 }
  0x8a   :  { %59 = vsyncpa [#allocation3], 1 }
  0x8b   :  { %60 = vsyncpa [#allocation4], 1 }

</bundles_post_ra>
